<compile_context>
chip_gen: v6e
topology: v6e:2x2x1
jax: 0.10.0
libtpu: 0.0.40
codegen_flags: <defaults>
</compile_context>

<pallas_src>
import functools

import jax
import jax.numpy as jnp
from jax.experimental import pallas as pl
from jax.experimental.pallas import tpu as pltpu


# ---------------------------------------------------------------------------
# Model hyper-parameters (synthetic, matching the module's __init__ structure)
# ---------------------------------------------------------------------------
ATOM_VOCAB_LEN = 10                 # len(ATOM_VOCAB)
D_N = ATOM_VOCAB_LEN + 18           # = 28  node input feature dim
IN_CHANNELS = 8                     # emb_linear output
EMB_SIZE = 32                       # args.emb_size
GCN_HIDDEN = EMB_SIZE * 2           # = 64  GCN layer width
LAYER_NUM_G = 3                     # number of GCN layers


def _softplus(x):
    # Numerically-stable Softplus (matches torch.nn.Softplus in f32 forward).
    return jnp.maximum(x, 0.0) + jnp.log1p(jnp.exp(-jnp.abs(x)))


def _vmem_limit_bytes():
    """Generation-aware scoped-VMEM limit: ~3/4 of physical VMEM per core.
    (~48 MiB on v7x, ~96 MiB on v5e/v6e); conservative fallback if the query fails."""
    cap = 64 * 1024 * 1024
    try:
        info = pltpu.get_tpu_info()
        v = getattr(info, "vmem_capacity_bytes", None)
        if isinstance(v, int) and v > 0:
            cap = v
    except Exception:
        pass
    return int(cap * 3 // 4)


def _fits_fused(n_pad, vmem_limit):
    """Fully-fused path needs: int8 adj + its in-kernel bf16 copy + f32/bf16
    activation intermediates, with headroom for compiler-internal scratch."""
    need = 3 * n_pad * n_pad + 4096 * n_pad + (1 << 20)
    return need <= (vmem_limit * 3) // 5


def _choose_row_tile(n_pad, vmem_limit):
    """Largest row tile (divisor of the 128-padded N) whose double-buffered int8
    adjacency tile stays within ~half the scoped VMEM limit."""
    budget = vmem_limit // 2
    for tm in (1024, 512, 256, 128):
        if n_pad % tm == 0 and 2 * tm * n_pad <= budget:
            return tm
    return 128


# ---------------------------------------------------------------------------
# Kernel A: fully-fused forward (adj resident in VMEM, read from HBM once).
# ---------------------------------------------------------------------------
def _fused_gcn_kernel(adj_ref, x_ref, wf_ref, w2_ref, w3_ref, pool_ref,
                      w_pred_ref, w_head_ref, b_head_ref, out_ref):
    f32 = jnp.float32
    bf16 = jnp.bfloat16
    adj = adj_ref[...].astype(bf16)                       # int8 (binary) -> bf16, exact

    # Layer 1 (emb_linear folded into the layer-1 weight), no residual.
    agg1 = jnp.dot(adj, x_ref[...], preferred_element_type=f32)
    h1 = jnp.maximum(jnp.dot(agg1.astype(bf16), wf_ref[...],
                             preferred_element_type=f32), 0.0)
    # Layer 2 (+ residual = layer input).
    agg2 = jnp.dot(adj, h1.astype(bf16), preferred_element_type=f32)
    h2 = jnp.maximum(jnp.dot(agg2.astype(bf16), w2_ref[...],
                             preferred_element_type=f32), 0.0) + h1
    # Layer 3 (+ residual).
    agg3 = jnp.dot(adj, h2.astype(bf16), preferred_element_type=f32)
    h3 = jnp.maximum(jnp.dot(agg3.astype(bf16), w3_ref[...],
                             preferred_element_type=f32), 0.0) + h2

    # SumPooling + pred_layer + fused mean/var heads.
    g = jnp.dot(pool_ref[...], h3.astype(bf16), preferred_element_type=f32)
    pred = jnp.maximum(jnp.dot(g.astype(bf16), w_pred_ref[...],
                               preferred_element_type=f32), 0.0)
    z = jnp.dot(pred, w_head_ref[...], preferred_element_type=f32) + b_head_ref[...]
    logvar = jnp.log(_softplus(z) + 1e-12)
    col = jax.lax.broadcasted_iota(jnp.int32, z.shape, 1)
    out_ref[...] = jnp.where(col == 0, z, logvar)         # [mean | logvar]


def _fused_forward(adj_i8, x_bf, w_fused, w2, w3, pool_bf, w_pred, w_head, b_head,
                   *, vmem_limit):
    n_pad = adj_i8.shape[0]
    b = pool_bf.shape[0]
    flops = (2 * n_pad * n_pad * (D_N + 2 * GCN_HIDDEN)
             + 2 * n_pad * GCN_HIDDEN * (D_N + 2 * GCN_HIDDEN)
             + 2 * b * n_pad * GCN_HIDDEN + 2 * b * GCN_HIDDEN * EMB_SIZE)
    bytes_accessed = (n_pad * n_pad                       # adj, int8, read once
                      + n_pad * D_N * 2 + 3 * GCN_HIDDEN * GCN_HIDDEN * 2
                      + b * n_pad * 2 + GCN_HIDDEN * EMB_SIZE * 2
                      + EMB_SIZE * 2 * 4 + b * 2 * 4)
    return pl.pallas_call(
        _fused_gcn_kernel,
        out_shape=jax.ShapeDtypeStruct((b, 2), jnp.float32),
        compiler_params=pltpu.CompilerParams(vmem_limit_bytes=vmem_limit),
        cost_estimate=pl.CostEstimate(flops=flops, transcendentals=4 * b,
                                      bytes_accessed=bytes_accessed),
    )(adj_i8, x_bf, w_fused, w2, w3, pool_bf, w_pred, w_head, b_head)


# ---------------------------------------------------------------------------
# Kernel B: streamed GCN layer (adj row tiles int8 -> bf16; h/weight resident).
# ---------------------------------------------------------------------------
def _gcn_layer_kernel(*refs, residual):
    if residual:
        adj_ref, h_ref, w_ref, res_ref, out_ref = refs
    else:
        adj_ref, h_ref, w_ref, out_ref = refs
    adj = adj_ref[...].astype(jnp.bfloat16)               # int8 -> bf16 in-kernel
    agg = jnp.dot(adj, h_ref[...], preferred_element_type=jnp.float32)
    z = jnp.dot(agg.astype(jnp.bfloat16), w_ref[...],
                preferred_element_type=jnp.float32)
    h_new = jnp.maximum(z, 0.0)
    if residual:
        h_new = h_new + res_ref[...].astype(jnp.float32)
    out_ref[...] = h_new.astype(out_ref.dtype)


def _gcn_layer_stream(adj_i8, h_bf, w_bf, *, residual, tm, vmem_limit):
    n_pad = adj_i8.shape[0]
    c_in = h_bf.shape[1]
    c_out = w_bf.shape[1]
    grid = (n_pad // tm,)
    in_specs = [
        pl.BlockSpec((tm, n_pad), lambda i: (i, 0)),      # adj row tile (int8, streamed)
        pl.BlockSpec((n_pad, c_in), lambda i: (0, 0)),    # full h (bf16, resident)
        pl.BlockSpec((c_in, c_out), lambda i: (0, 0)),    # weight (bf16, resident)
    ]
    args = [adj_i8, h_bf, w_bf]
    if residual:
        in_specs.append(pl.BlockSpec((tm, c_out), lambda i: (i, 0)))  # residual tile
        args.append(h_bf)
    flops = 2 * n_pad * n_pad * c_in + 2 * n_pad * c_in * c_out
    bytes_accessed = (n_pad * n_pad + n_pad * c_in * 2 + c_in * c_out * 2
                      + n_pad * c_out * 2)
    return pl.pallas_call(
        functools.partial(_gcn_layer_kernel, residual=residual),
        out_shape=jax.ShapeDtypeStruct((n_pad, c_out), jnp.bfloat16),
        grid=grid,
        in_specs=in_specs,
        out_specs=pl.BlockSpec((tm, c_out), lambda i: (i, 0)),
        compiler_params=pltpu.CompilerParams(
            dimension_semantics=("parallel",),
            vmem_limit_bytes=vmem_limit),
        cost_estimate=pl.CostEstimate(flops=flops, transcendentals=0,
                                      bytes_accessed=bytes_accessed),
    )(*args)


# ---------------------------------------------------------------------------
# Kernel C: streamed layer 3 fused with SumPooling + pred/mean/var heads.
#   (h3 is never written back to HBM; pooled embedding accumulated in VMEM.)
# ---------------------------------------------------------------------------
def _gcn_layer3_head_kernel(adj_ref, h_ref, w_ref, res_ref, pool_ref,
                            w_pred_ref, w_head_ref, b_head_ref,
                            out_ref, acc_ref):
    k = pl.program_id(0)

    @pl.when(k == 0)
    def _():
        acc_ref[...] = jnp.zeros_like(acc_ref)

    adj = adj_ref[...].astype(jnp.bfloat16)
    agg = jnp.dot(adj, h_ref[...], preferred_element_type=jnp.float32)
    z = jnp.dot(agg.astype(jnp.bfloat16), w_ref[...],
                preferred_element_type=jnp.float32)
    h3 = jnp.maximum(z, 0.0) + res_ref[...].astype(jnp.float32)       # (tm, 64)
    acc_ref[...] += jnp.dot(pool_ref[...], h3.astype(jnp.bfloat16),
                            preferred_element_type=jnp.float32)

    @pl.when(k == pl.num_programs(0) - 1)
    def _():
        g = acc_ref[...]                                              # (B, 64)
        pred = jnp.maximum(jnp.dot(g.astype(jnp.bfloat16), w_pred_ref[...],
                                   preferred_element_type=jnp.float32), 0.0)
        zz = (jnp.dot(pred, w_head_ref[...], preferred_element_type=jnp.float32)
              + b_head_ref[...])                                      # (B, 2)
        logvar = jnp.log(_softplus(zz) + 1e-12)
        col = jax.lax.broadcasted_iota(jnp.int32, zz.shape, 1)
        out_ref[...] = jnp.where(col == 0, zz, logvar)                # [mean | logvar]


def _gcn_layer3_head_stream(adj_i8, h_bf, w_bf, pool_bf, w_pred, w_head, b_head,
                            *, tm, vmem_limit):
    n_pad = adj_i8.shape[0]
    b = pool_bf.shape[0]
    c = GCN_HIDDEN
    grid = (n_pad // tm,)
    flops = (2 * n_pad * n_pad * c + 2 * n_pad * c * c + 2 * b * n_pad * c
             + 2 * b * c * EMB_SIZE + 2 * b * EMB_SIZE * 2)
    bytes_accessed = (n_pad * n_pad + 2 * n_pad * c * 2 + c * c * 2
                      + b * n_pad * 2 + c * EMB_SIZE * 2 + EMB_SIZE * 2 * 4
                      + b * 2 * 4)
    return pl.pallas_call(
        _gcn_layer3_head_kernel,
        out_shape=jax.ShapeDtypeStruct((b, 2), jnp.float32),
        grid=grid,
        in_specs=[
            pl.BlockSpec((tm, n_pad), lambda i: (i, 0)),       # adj row tile (int8)
            pl.BlockSpec((n_pad, c), lambda i: (0, 0)),        # full h2 (resident)
            pl.BlockSpec((c, c), lambda i: (0, 0)),            # w3 (resident)
            pl.BlockSpec((tm, c), lambda i: (i, 0)),           # residual row tile (h2)
            pl.BlockSpec((b, tm), lambda i: (0, i)),           # pool column tile
            pl.BlockSpec((c, EMB_SIZE), lambda i: (0, 0)),     # w_pred
            pl.BlockSpec((EMB_SIZE, 2), lambda i: (0, 0)),     # fused mean/var weight
            pl.BlockSpec((1, 2), lambda i: (0, 0)),            # fused mean/var bias
        ],
        out_specs=pl.BlockSpec((b, 2), lambda i: (0, 0)),
        scratch_shapes=[pltpu.VMEM((b, c), jnp.float32)],
        compiler_params=pltpu.CompilerParams(
            dimension_semantics=("arbitrary",),                # sequential accumulation
            vmem_limit_bytes=vmem_limit),
        cost_estimate=pl.CostEstimate(flops=flops, transcendentals=4 * b,
                                      bytes_accessed=bytes_accessed),
    )(adj_i8, h_bf, w_bf, h_bf, pool_bf, w_pred, w_head, b_head)


# ---------------------------------------------------------------------------
# Wrapper
# ---------------------------------------------------------------------------
def gcn_active_forward(x, adj, pool, params, *, force_streamed=False):
    """Fused GCNActive forward. Returns (pred_mean, pred_logvar), each (B, 1) f32."""
    (w_emb, w1, w2, w3, w_pred, w_mean, b_mean, w_var, b_var) = params
    n = x.shape[0]

    vmem_limit = _vmem_limit_bytes()

    # Fold emb_linear into the layer-1 weight; fuse the mean/var heads; bf16 weights.
    w_fused = (w_emb @ w1).astype(jnp.bfloat16)            # (D_N, GCN_HIDDEN)
    w2_bf = w2.astype(jnp.bfloat16)
    w3_bf = w3.astype(jnp.bfloat16)
    w_pred_bf = w_pred.astype(jnp.bfloat16)
    w_head = jnp.concatenate([w_mean, w_var], axis=1)      # (EMB_SIZE, 2) f32
    b_head = jnp.concatenate([b_mean, b_var], axis=1)      # (1, 2) f32

    # Pad N only to the 128-lane requirement (not to the row tile).
    n_pad = ((n + 127) // 128) * 128
    pad = n_pad - n
    # Binary adjacency/pool are exact in int8/bf16; activations stream as bf16;
    # every matmul accumulates in f32 via preferred_element_type.
    # NOTE: the int8 cast assumes a binary (unnormalized sum-aggregation) adjacency,
    # which is what GCN_MC's update_all(copy_src, sum) implies.
    x_bf = jnp.pad(x, ((0, pad), (0, 0))).astype(jnp.bfloat16)
    adj_i8 = jnp.pad(adj, ((0, pad), (0, pad))).astype(jnp.int8)
    pool_bf = jnp.pad(pool, ((0, 0), (0, pad))).astype(jnp.bfloat16)

    if (not force_streamed) and _fits_fused(n_pad, vmem_limit):
        # adj read from HBM exactly once; everything else stays in VMEM.
        out = _fused_forward(adj_i8, x_bf, w_fused, w2_bf, w3_bf, pool_bf,
                             w_pred_bf, w_head, b_head, vmem_limit=vmem_limit)
    else:
        tm = _choose_row_tile(n_pad, vmem_limit)
        h1 = _gcn_layer_stream(adj_i8, x_bf, w_fused, residual=False,
                               tm=tm, vmem_limit=vmem_limit)            # (N_pad, 64)
        h2 = _gcn_layer_stream(adj_i8, h1, w2_bf, residual=True,
                               tm=tm, vmem_limit=vmem_limit)
        out = _gcn_layer3_head_stream(adj_i8, h2, w3_bf, pool_bf, w_pred_bf,
                                      w_head, b_head, tm=tm, vmem_limit=vmem_limit)
    return out[:, 0:1], out[:, 1:2]


# ---------------------------------------------------------------------------
# Pure-JAX f32 reference (for a sanity check)
# ---------------------------------------------------------------------------
def reference_forward(x, adj, pool, params):
    (w_emb, w1, w2, w3, w_pred, w_mean, b_mean, w_var, b_var) = params
    h = x @ w_emb
    h1 = jnp.maximum(adj @ h @ w1, 0.0)
    h2 = jnp.maximum(adj @ h1 @ w2, 0.0) + h1
    h3 = jnp.maximum(adj @ h2 @ w3, 0.0) + h2
    g = pool @ h3
    pred = jnp.maximum(g @ w_pred, 0.0)
    mean = pred @ w_mean + b_mean
    var = _softplus(pred @ w_var + b_var)
    return mean, jnp.log(var + 1e-12)


# ---------------------------------------------------------------------------
# Deterministic parameter / input construction
# ---------------------------------------------------------------------------
def make_params(key):
    ks = jax.random.split(key, 9)
    scale = 0.1
    w_emb = scale * jax.random.normal(ks[0], (D_N, IN_CHANNELS), jnp.float32)
    w1 = scale * jax.random.normal(ks[1], (IN_CHANNELS, GCN_HIDDEN), jnp.float32)
    w2 = scale * jax.random.normal(ks[2], (GCN_HIDDEN, GCN_HIDDEN), jnp.float32)
    w3 = scale * jax.random.normal(ks[3], (GCN_HIDDEN, GCN_HIDDEN), jnp.float32)
    w_pred = scale * jax.random.normal(ks[4], (GCN_HIDDEN, EMB_SIZE), jnp.float32)
    w_mean = scale * jax.random.normal(ks[5], (EMB_SIZE, 1), jnp.float32)
    b_mean = scale * jax.random.normal(ks[6], (1, 1), jnp.float32)
    w_var = scale * jax.random.normal(ks[7], (EMB_SIZE, 1), jnp.float32)
    b_var = scale * jax.random.normal(ks[8], (1, 1), jnp.float32)
    return (w_emb, w1, w2, w3, w_pred, w_mean, b_mean, w_var, b_var)


def make_batched_graph(key, n_graphs=2, nodes_per_graph=8):
    """Block-diagonal undirected ring graphs: features, adjacency, pooling matrix."""
    n = n_graphs * nodes_per_graph
    x = jax.random.normal(key, (n, D_N), jnp.float32)

    adj = jnp.zeros((n, n), jnp.float32)
    for g in range(n_graphs):
        off = g * nodes_per_graph
        for i in range(nodes_per_graph):
            src = off + i
            dst = off + (i + 1) % nodes_per_graph
            adj = adj.at[dst, src].set(1.0)   # edge src -> dst
            adj = adj.at[src, dst].set(1.0)   # undirected

    pool = jnp.zeros((n_graphs, n), jnp.float32)
    for g in range(n_graphs):
        pool = pool.at[g, g * nodes_per_graph:(g + 1) * nodes_per_graph].set(1.0)
    return x, adj, pool


if __name__ == "__main__":
    key = jax.random.PRNGKey(0)
    k_param, k_feat = jax.random.split(key)

    params = make_params(k_param)
    x, adj, pool = make_batched_graph(k_feat, n_graphs=2, nodes_per_graph=8)

    ref_mean, ref_logvar = reference_forward(x, adj, pool, params)

    # Auto path (small graph -> fully-fused single pallas_call, adj read once).
    mean, logvar = gcn_active_forward(x, adj, pool, params)
    jax.block_until_ready((mean, logvar))
    assert mean.shape == ref_mean.shape and logvar.shape == ref_logvar.shape
    # int8 adjacency is exact; bf16 activations/weights -> relaxed tolerance vs f32.
    assert jnp.allclose(mean, ref_mean, atol=3e-2, rtol=3e-2)
    assert jnp.allclose(logvar, ref_logvar, atol=3e-2, rtol=3e-2)

    # Also exercise the streamed (large-graph) path on the same inputs.
    mean_s, logvar_s = gcn_active_forward(x, adj, pool, params, force_streamed=True)
    jax.block_until_ready((mean_s, logvar_s))
    assert jnp.allclose(mean_s, ref_mean, atol=3e-2, rtol=3e-2)
    assert jnp.allclose(logvar_s, ref_logvar, atol=3e-2, rtol=3e-2)

    print("KERNEL_OK")
</pallas_src>

<mosaic_0001>
module attributes {stable_mosaic.version = 11 : i64} {
  func.func @_fused_gcn_kernel(%arg0: memref<128x128xi8, #tpu.memory_space<vmem>>, %arg1: memref<128x28xbf16, #tpu.memory_space<vmem>>, %arg2: memref<28x64xbf16, #tpu.memory_space<vmem>>, %arg3: memref<64x64xbf16, #tpu.memory_space<vmem>>, %arg4: memref<64x64xbf16, #tpu.memory_space<vmem>>, %arg5: memref<2x128xbf16, #tpu.memory_space<vmem>>, %arg6: memref<64x32xbf16, #tpu.memory_space<vmem>>, %arg7: memref<32x2xf32, #tpu.memory_space<vmem>>, %arg8: memref<1x2xf32, #tpu.memory_space<vmem>>, %arg9: memref<2x2xf32, #tpu.memory_space<vmem>>) attributes {dimension_semantics = [], scalar_prefetch = 0 : i64, scratch_operands = 0 : i64, tpu.core_type = #tpu.core_type<tc>} {
    %c0 = arith.constant 0 : index
    %c0_0 = arith.constant 0 : index
    %0 = vector.load %arg0[%c0, %c0_0] : memref<128x128xi8, #tpu.memory_space<vmem>>, vector<128x128xi8>
    %1 = arith.sitofp %0 : vector<128x128xi8> to vector<128x128xbf16>
    %c0_1 = arith.constant 0 : index
    %c0_2 = arith.constant 0 : index
    %2 = vector.load %arg1[%c0_1, %c0_2] : memref<128x28xbf16, #tpu.memory_space<vmem>>, vector<128x28xbf16>
    %cst = arith.constant dense<0.000000e+00> : vector<128x28xf32>
    %3 = tpu.matmul %1, %2, %cst {dimension_numbers = #tpu.dot_dimension_numbers<[1], [0], [0], [1], [0, 0, 1, 1], [], []>} : vector<128x128xbf16>, vector<128x28xbf16>, vector<128x28xf32> -> vector<128x28xf32>
    %4 = arith.truncf %3 : vector<128x28xf32> to vector<128x28xbf16>
    %c0_3 = arith.constant 0 : index
    %c0_4 = arith.constant 0 : index
    %5 = vector.load %arg2[%c0_3, %c0_4] : memref<28x64xbf16, #tpu.memory_space<vmem>>, vector<28x64xbf16>
    %cst_5 = arith.constant dense<0.000000e+00> : vector<128x64xf32>
    %6 = tpu.matmul %4, %5, %cst_5 {dimension_numbers = #tpu.dot_dimension_numbers<[1], [0], [0], [1], [0, 0, 1, 1], [], []>} : vector<128x28xbf16>, vector<28x64xbf16>, vector<128x64xf32> -> vector<128x64xf32>
    %cst_6 = arith.constant 0.000000e+00 : f32
    %7 = vector.broadcast %cst_6 : f32 to vector<128x64xf32>
    %8 = arith.maximumf %6, %7 : vector<128x64xf32>
    %9 = arith.truncf %8 : vector<128x64xf32> to vector<128x64xbf16>
    %cst_7 = arith.constant dense<0.000000e+00> : vector<128x64xf32>
    %10 = tpu.matmul %1, %9, %cst_7 {dimension_numbers = #tpu.dot_dimension_numbers<[1], [0], [0], [1], [0, 0, 1, 1], [], []>} : vector<128x128xbf16>, vector<128x64xbf16>, vector<128x64xf32> -> vector<128x64xf32>
    %11 = arith.truncf %10 : vector<128x64xf32> to vector<128x64xbf16>
    %c0_8 = arith.constant 0 : index
    %c0_9 = arith.constant 0 : index
    %12 = vector.load %arg3[%c0_8, %c0_9] : memref<64x64xbf16, #tpu.memory_space<vmem>>, vector<64x64xbf16>
    %cst_10 = arith.constant dense<0.000000e+00> : vector<128x64xf32>
    %13 = tpu.matmul %11, %12, %cst_10 {dimension_numbers = #tpu.dot_dimension_numbers<[1], [0], [0], [1], [0, 0, 1, 1], [], []>} : vector<128x64xbf16>, vector<64x64xbf16>, vector<128x64xf32> -> vector<128x64xf32>
    %cst_11 = arith.constant 0.000000e+00 : f32
    %14 = vector.broadcast %cst_11 : f32 to vector<128x64xf32>
    %15 = arith.maximumf %13, %14 : vector<128x64xf32>
    %16 = arith.addf %15, %8 : vector<128x64xf32>
    %17 = arith.truncf %16 : vector<128x64xf32> to vector<128x64xbf16>
    %cst_12 = arith.constant dense<0.000000e+00> : vector<128x64xf32>
    %18 = tpu.matmul %1, %17, %cst_12 {dimension_numbers = #tpu.dot_dimension_numbers<[1], [0], [0], [1], [0, 0, 1, 1], [], []>} : vector<128x128xbf16>, vector<128x64xbf16>, vector<128x64xf32> -> vector<128x64xf32>
    %19 = arith.truncf %18 : vector<128x64xf32> to vector<128x64xbf16>
    %c0_13 = arith.constant 0 : index
    %c0_14 = arith.constant 0 : index
    %20 = vector.load %arg4[%c0_13, %c0_14] : memref<64x64xbf16, #tpu.memory_space<vmem>>, vector<64x64xbf16>
    %cst_15 = arith.constant dense<0.000000e+00> : vector<128x64xf32>
    %21 = tpu.matmul %19, %20, %cst_15 {dimension_numbers = #tpu.dot_dimension_numbers<[1], [0], [0], [1], [0, 0, 1, 1], [], []>} : vector<128x64xbf16>, vector<64x64xbf16>, vector<128x64xf32> -> vector<128x64xf32>
    %cst_16 = arith.constant 0.000000e+00 : f32
    %22 = vector.broadcast %cst_16 : f32 to vector<128x64xf32>
    %23 = arith.maximumf %21, %22 : vector<128x64xf32>
    %24 = arith.addf %23, %16 : vector<128x64xf32>
    %c0_17 = arith.constant 0 : index
    %c0_18 = arith.constant 0 : index
    %25 = vector.load %arg5[%c0_17, %c0_18] : memref<2x128xbf16, #tpu.memory_space<vmem>>, vector<2x128xbf16>
    %26 = arith.truncf %24 : vector<128x64xf32> to vector<128x64xbf16>
    %cst_19 = arith.constant dense<0.000000e+00> : vector<2x64xf32>
    %27 = tpu.matmul %25, %26, %cst_19 {dimension_numbers = #tpu.dot_dimension_numbers<[1], [0], [0], [1], [0, 0, 1, 1], [], []>} : vector<2x128xbf16>, vector<128x64xbf16>, vector<2x64xf32> -> vector<2x64xf32>
    %28 = arith.truncf %27 : vector<2x64xf32> to vector<2x64xbf16>
    %c0_20 = arith.constant 0 : index
    %c0_21 = arith.constant 0 : index
    %29 = vector.load %arg6[%c0_20, %c0_21] : memref<64x32xbf16, #tpu.memory_space<vmem>>, vector<64x32xbf16>
    %cst_22 = arith.constant dense<0.000000e+00> : vector<2x32xf32>
    %30 = tpu.matmul %28, %29, %cst_22 {dimension_numbers = #tpu.dot_dimension_numbers<[1], [0], [0], [1], [0, 0, 1, 1], [], []>} : vector<2x64xbf16>, vector<64x32xbf16>, vector<2x32xf32> -> vector<2x32xf32>
    %cst_23 = arith.constant 0.000000e+00 : f32
    %31 = vector.broadcast %cst_23 : f32 to vector<2x32xf32>
    %32 = arith.maximumf %30, %31 : vector<2x32xf32>
    %c0_24 = arith.constant 0 : index
    %c0_25 = arith.constant 0 : index
    %33 = vector.load %arg7[%c0_24, %c0_25] : memref<32x2xf32, #tpu.memory_space<vmem>>, vector<32x2xf32>
    %cst_26 = arith.constant dense<0.000000e+00> : vector<2x2xf32>
    %34 = tpu.matmul %32, %33, %cst_26 {dimension_numbers = #tpu.dot_dimension_numbers<[1], [0], [0], [1], [0, 0, 1, 1], [], []>} : vector<2x32xf32>, vector<32x2xf32>, vector<2x2xf32> -> vector<2x2xf32>
    %c0_27 = arith.constant 0 : index
    %c0_28 = arith.constant 0 : index
    %35 = vector.load %arg8[%c0_27, %c0_28] : memref<1x2xf32, #tpu.memory_space<vmem>>, vector<1x2xf32>
    %36 = vector.broadcast %35 : vector<1x2xf32> to vector<2x2xf32>
    %37 = arith.addf %34, %36 : vector<2x2xf32>
    %cst_29 = arith.constant 0.000000e+00 : f32
    %38 = vector.broadcast %cst_29 : f32 to vector<2x2xf32>
    %39 = arith.maximumf %37, %38 : vector<2x2xf32>
    %40 = math.absf %37 : vector<2x2xf32>
    %cst_30 = arith.constant 0.000000e+00 : f32
    %41 = vector.broadcast %cst_30 : f32 to vector<2x2xf32>
    %42 = arith.subf %41, %40 : vector<2x2xf32>
    %43 = math.exp %42 : vector<2x2xf32>
    %44 = math.log1p %43 : vector<2x2xf32>
    %45 = arith.addf %39, %44 : vector<2x2xf32>
    %cst_31 = arith.constant 9.99999996E-13 : f32
    %46 = vector.broadcast %cst_31 : f32 to vector<2x2xf32>
    %47 = arith.addf %45, %46 : vector<2x2xf32>
    %48 = math.log %47 : vector<2x2xf32>
    %49 = tpu.iota {dimensions = array<i32: 1>} : vector<2x2xi32>
    %c0_i32 = arith.constant 0 : i32
    %50 = vector.broadcast %c0_i32 : i32 to vector<2x2xi32>
    %51 = arith.cmpi eq, %49, %50 : vector<2x2xi32>
    %52 = arith.select %51, %37, %48 : vector<2x2xi1>, vector<2x2xf32>
    %c0_32 = arith.constant 0 : index
    %c0_33 = arith.constant 0 : index
    %53 = vector.load %arg9[%c0_32, %c0_33] : memref<2x2xf32, #tpu.memory_space<vmem>>, vector<2x2xf32>
    tpu.vector_store %arg9[%c0_32, %c0_33], %52 {strides = array<i32>} : memref<2x2xf32, #tpu.memory_space<vmem>>, vector<2x2xf32>,
    return
  }
}

</mosaic_0001>

<bundles_post_ra>
// kernel: tpu_custom_call.1
= control target key start
LH: loop header
LB: loop body
LE: loop exit
PB: predicated region body
PF: predicated region fallthrough
CT: control target
= control target key end

     0   :  { %s2053_s0 = inlined_call_operand.vmem [shape: s8[128,128], index: 0, kind: input, shape index: {}]   ;;  %s2054_s1 = inlined_call_operand.vmem [shape: bf16[128,28], index: 1, kind: input, shape index: {}]   ;;  %s2055_s2 = inlined_call_operand.vmem [shape: bf16[28,64], index: 2, kind: input, shape index: {}]   ;;  %s2056_s3 = inlined_call_operand.vmem [shape: bf16[64,64], index: 3, kind: input, shape index: {}]   ;;  %s2057_s4 = inlined_call_operand.vmem [shape: bf16[64,64], index: 4, kind: input, shape index: {}]   ;;  %s2058_s5 = inlined_call_operand.vmem [shape: bf16[2,128], index: 5, kind: input, shape index: {}]   ;;  %s2059_s6 = inlined_call_operand.vmem [shape: bf16[64,32], index: 6, kind: input, shape index: {}]   ;;  %s2060_s7 = inlined_call_operand.vmem [shape: f32[32,2], index: 7, kind: input, shape index: {}]   ;;  %s2061_s8 = inlined_call_operand.vmem [shape: f32[1,2], index: 8, kind: input, shape index: {}]   ;;  %s2062_s9 = inlined_call_operand.hbm [shape: f32[2,2], index: 9, kind: output, shape index: {}]  }
   0x1   :  { %v1579_v0 = vld [vmem:[%s2054_s1 + $0x38] sm:$0xff]   ;;  %v1580_v1 = vld [vmem:[%s2054_s1 + $0x30] sm:$0xff]   ;;  %v1581_v2 = vld [vmem:[%s2054_s1 + $0x28] sm:$0xff]  }
   0x2   :  { %1368 = vmatprep.subr.bf16.mxu0 %v1579_v0  ;;  %v1582_v3 = vld [vmem:[%s2054_s1 + $0x20] sm:$0xff]   ;;  %v1583_v6 = vld [vmem:[%s2054_s1 + $0x18] sm:$0xff]   ;;  %v1584_v7 = vld [vmem:[%s2054_s1 + $0x10] sm:$0xff]  }
   0x3   :  { %1369 = vmatpush3.bf16.msra.mxu0 %v1579_v0  ;;  %v34_v4 = vld [vmem:[%s2053_s0] sm:$0xff] }
   0x4   :  { %1370 = vmatprep.subr.bf16.mxu0 %v1580_v1  ;;  %v1697_v5 = vunpack.c.l.s8.bf16 %v34_v4 }
   0x6   :  { %1384 = vmatprep.mubr.bf16.mxu0 %v1697_v5 }
   0x7   :  { %1371 = vmatpush3.bf16.msra.mxu0 %v1580_v1 }
   0x8   :  { %1372 = vmatprep.subr.bf16.mxu0 %v1581_v2 }
   0xb   :  { %1373 = vmatpush3.bf16.msra.mxu0 %v1581_v2 }
   0xc   :  { %1374 = vmatprep.subr.bf16.mxu0 %v1582_v3 }
   0xf   :  { %1375 = vmatpush3.bf16.msra.mxu0 %v1582_v3 }
  0x10   :  { %1376 = vmatprep.subr.bf16.mxu0 %v1583_v6 }
  0x11   :  { %14 = vsyncpa [#allocation3], 0  ;;  %v1585_v8 = vld [vmem:[%s2054_s1 + $0x8] sm:$0xff]   ;;  %v1586_v9 = vld [vmem:[%s2054_s1] sm:$0xff]   ;;  %v1715_v11 = vunpack.c.h.s8.bf16 %v34_v4  ;;  %vm255_vm0 = vcmask 1045504   ;;  %vm230_vm1 = vcmask 228352  }
  0x12   :  { %v35_v10 = vld [vmem:[%s2053_s0 + $0x8] sm:$0xff]  ;;  %v36_v13 = vld [vmem:[%s2053_s0 + $0x10] sm:$0xff]  ;;  %v37_v16 = vld [vmem:[%s2053_s0 + $0x18] sm:$0xff]  ;;  %vm517_vm2 = vcmask 523264   ;;  %vm1630_vm3 = vmmov 0   ;;  %vm1106_vm4 = vcmask 261120  }
  0x13   :  { %1377 = vmatpush3.bf16.msra.mxu0 %v1583_v6  ;;  %v1717_v12 = vunpack.c.l.s8.bf16 %v35_v10  ;;  %v1724_v14 = vunpack.c.h.s8.bf16 %v35_v10  ;;  %v1726_v15 = vunpack.c.l.s8.bf16 %v36_v13  ;;  %v1733_v17 = vunpack.c.h.s8.bf16 %v36_v13  ;;  %v1587_v20 = vld [vmem:[%s2055_s2 + $0x8] sm:$0x3f]   ;;  %v1588_v22 = vld [vmem:[%s2055_s2] sm:$0xff]   ;;  %v1589_v47 = vld [vmem:[%s2056_s3 + $0x18] sm:$0xff]  }
  0x14   :  { %1378 = vmatprep.subr.bf16.mxu0 %v1584_v7  ;;  %v1735_v18 = vunpack.c.l.s8.bf16 %v37_v16  ;;  %v1739_v19 = vunpack.c.h.s8.bf16 %v37_v16  ;;  %1575 = vmatprep.subr.msk.bf16.mxu1 %vm255_vm0, %v1587_v20  ;;  %v257_v21 = vsel %vm255_vm0, %v1587_v20, 0  ;;  %v1590_v48 = vld [vmem:[%s2056_s3 + $0x10] sm:$0xff]   ;;  %v1591_v49 = vld [vmem:[%s2056_s3 + $0x8] sm:$0xff]   ;;  %vm1202_vm7 = vcmask 9216  }
  0x15   :  { %1401 = vmatpush3.bf16.msra.mxu1 %v257_v21 }
  0x16   :  { %1402 = vmatprep.subr.bf16.mxu1 %v1588_v22 }
  0x17   :  { %1379 = vmatpush3.bf16.msra.mxu0 %v1584_v7 }
  0x18   :  { %1380 = vmatprep.subr.bf16.mxu0 %v1585_v8 }
  0x19   :  { %1403 = vmatpush3.bf16.msra.mxu1 %v1588_v22 }
  0x1b   :  { %1381 = vmatpush3.bf16.msra.mxu0 %v1585_v8 }
  0x1c   :  { %1382 = vmatprep.subr.bf16.mxu0 %v1586_v9 }
  0x1f   :  { %1383 = vmatpush3.bf16.msra.mxu0 %v1586_v9 }
  0x20   :  { %1452 = vmatprep.subr.bf16.mxu0 %v1589_v47 }
  0x22   :  { %1385 = vmatmul.mubr.bf16.vlgmr.msra.gmra.mxu0 %v1715_v11 }
  0x23   :  { %1388 = vmatprep.mubr.bf16.mxu0 %v1717_v12  ;;  %1453 = vmatpush3.bf16.msra.mxu0 %v1589_v47 }
  0x24   :  { %1454 = vmatprep.subr.bf16.mxu0 %v1590_v48 }
  0x27   :  { %1455 = vmatpush3.bf16.msra.mxu0 %v1590_v48 }
  0x28   :  { %1456 = vmatprep.subr.bf16.mxu0 %v1591_v49 }
  0x2a   :  { %1389 = vmatmul.mubr.bf16.gmra.mxu0 %v1724_v14 }
  0x2b   :  { %1392 = vmatprep.mubr.bf16.mxu0 %v1726_v15  ;;  %1457 = vmatpush3.bf16.msra.mxu0 %v1591_v49 }
  0x32   :  { %1393 = vmatmul.mubr.bf16.gmra.mxu0 %v1733_v17 }
  0x33   :  { %1396 = vmatprep.mubr.bf16.mxu0 %v1735_v18 }
  0x3a   :  { %1397 = vmatmul.mubr.bf16.gmra.mxu0 %v1739_v19 }
  0xe2   :  { %v1386_v23 = vpop.f32.mrf.mxu0 }
  0xe4   :  { %v144_v24 = vpop.f32.mrf.mxu0 }
  0xe6   :  { %v1387_v25 = vpop.f32.mrf.mxu0 }
  0xe7   :  { %v208_v28 = vpack.c.bf16 %v1387_v25, %v1386_v23 }
  0xe8   :  { %v147_v26 = vpop.f32.mrf.mxu0 }
  0xe9   :  { %v207_v27 = vpack.c.bf16 %v147_v26, %v144_v24 }
  0xea   :  { %v1390_v29 = vpop.f32.mrf.mxu0 }
  0xeb   :  { %1404 = vmatprep.mubr.msk.bf16.mxu1 %vm230_vm1, %v207_v27 }
  0xec   :  { %v160_v30 = vpop.f32.mrf.mxu0  ;;  %1405 = vmatmul.mubr.msk.bf16.vlgmr.msra.gmra.mxu1 %vm230_vm1, %v208_v28 }
  0xee   :  { %v1391_v31 = vpop.f32.mrf.mxu0 }
  0xef   :  { %v210_v34 = vpack.c.bf16 %v1391_v31, %v1390_v29 }
  0xf0   :  { %v163_v32 = vpop.f32.mrf.mxu0 }
  0xf1   :  { %v209_v33 = vpack.c.bf16 %v163_v32, %v160_v30 }
  0xf2   :  { %v1394_v35 = vpop.f32.mrf.mxu0 }
  0xf3   :  { %1408 = vmatprep.mubr.msk.bf16.mxu1 %vm230_vm1, %v209_v33 }
  0xf4   :  { %v176_v36 = vpop.f32.mrf.mxu0  ;;  %1409 = vmatmul.mubr.msk.bf16.gmra.mxu1 %vm230_vm1, %v210_v34  ;;  %v1592_v34 = vld [vmem:[%s2056_s3] sm:$0xff]  }
  0xf5   :  { %1458 = vmatprep.subr.bf16.mxu0 %v1592_v34 }
  0xf6   :  { %v1395_v37 = vpop.f32.mrf.mxu0  ;;  %1459 = vmatpush3.bf16.msra.mxu0 %v1592_v34  ;;  %v1593_v34 = vld [vmem:[%s2057_s4 + $0x18] sm:$0xff]  }
  0xf7   :  { %v212_v40 = vpack.c.bf16 %v1395_v37, %v1394_v35  ;;  %1508 = vmatprep.subr.bf16.mxu0 %v1593_v34 }
  0xf8   :  { %v179_v38 = vpop.f32.mrf.mxu0 }
  0xf9   :  { %v211_v39 = vpack.c.bf16 %v179_v38, %v176_v36 }
  0xfa   :  { %v1398_v41 = vpop.f32.mrf.mxu0 }
  0xfb   :  { %1412 = vmatprep.mubr.msk.bf16.mxu1 %vm230_vm1, %v211_v39 }
  0xfc   :  { %v192_v42 = vpop.f32.mrf.mxu0  ;;  %1413 = vmatmul.mubr.msk.bf16.gmra.mxu1 %vm230_vm1, %v212_v40 }
  0xfe   :  { %v1399_v43 = vpop.f32.mrf.mxu0 }
  0xff   :  { %v214_v46 = vpack.c.bf16 %v1399_v43, %v1398_v41 }
 0x100   :  { %v195_v44 = vpop.f32.mrf.mxu0 }
 0x101   :  { %v213_v45 = vpack.c.bf16 %v195_v44, %v192_v42 }
 0x103   :  { %1416 = vmatprep.mubr.msk.bf16.mxu1 %vm230_vm1, %v213_v45 }
 0x104   :  { %1417 = vmatmul.mubr.msk.bf16.gmra.mxu1 %vm230_vm1, %v214_v46 }
 0x105   :  { %1436 = vmatprep.mubr.bf16.mxu1 %v1697_v5 }
 0x1ac   :  { %v1766_v50 = vpop.f32.mrf.mxu1 }
 0x1ad   :  { %v358_v29 = vmax.f32 %v1766_v50, 0.0 }
 0x1ae   :  { %v1768_v51 = vpop.f32.mrf.mxu1 }
 0x1af   :  { %v356_v32 = vmax.f32 %v1768_v51, 0.0  ;;  %v1596_v51 = vld [vmem:[%s2057_s4] sm:$0xff]  }
 0x1b0   :  { %v1770_v52 = vpop.f32.mrf.mxu1 }
 0x1b1   :  { %v359_v27 = vmax.f32 %v1770_v52, 0.0 }
 0x1b2   :  { %v1772_v53 = vpop.f32.mrf.mxu1 }
 0x1b3   :  { %v373_v30 = vpack.c.bf16 %v359_v27, %v358_v29  ;;  %v357_v31 = vmax.f32 %v1772_v53, 0.0 }
 0x1b4   :  { %v1774_v54 = vpop.f32.mrf.mxu1 }
 0x1b5   :  { %v362_v23 = vmax.f32 %v1774_v54, 0.0  ;;  %v372_v33 = vpack.c.bf16 %v357_v31, %v356_v32 }
 0x1b6   :  { %v1776_v55 = vpop.f32.mrf.mxu1 }
 0x1b7   :  { %v360_v26 = vmax.f32 %v1776_v55, 0.0 }
 0x1b8   :  { %v1778_v56 = vpop.f32.mrf.mxu1 }
 0x1b9   :  { %v363_v21 = vmax.f32 %v1778_v56, 0.0 }
 0x1ba   :  { %v1780_v57 = vpop.f32.mrf.mxu1 }
 0x1bb   :  { %v375_v24 = vpack.c.bf16 %v363_v21, %v362_v23  ;;  %v361_v25 = vmax.f32 %v1780_v57, 0.0 }
 0x1bc   :  { %v1782_v58 = vpop.f32.mrf.mxu1 }
 0x1bd   :  { %v366_v10 = vmax.f32 %v1782_v58, 0.0  ;;  %v374_v28 = vpack.c.bf16 %v361_v25, %v360_v26 }
 0x1be   :  { %v1784_v59 = vpop.f32.mrf.mxu1 }
 0x1bf   :  { %v364_v20 = vmax.f32 %v1784_v59, 0.0 }
 0x1c0   :  { %v1786_v60 = vpop.f32.mrf.mxu1 }
 0x1c1   :  { %v367_v8 = vmax.f32 %v1786_v60, 0.0 }
 0x1c2   :  { %v1788_v61 = vpop.f32.mrf.mxu1 }
 0x1c3   :  { %v377_v13 = vpack.c.bf16 %v367_v8, %v366_v10  ;;  %v365_v16 = vmax.f32 %v1788_v61, 0.0 }
 0x1c4   :  { %v1790_v62 = vpop.f32.mrf.mxu1 }
 0x1c5   :  { %v370_v1 = vmax.f32 %v1790_v62, 0.0  ;;  %v376_v22 = vpack.c.bf16 %v365_v16, %v364_v20 }
 0x1c6   :  { %v1792_v63 = vpop.f32.mrf.mxu1 }
 0x1c7   :  { %v368_v4 = vmax.f32 %v1792_v63, 0.0 }
 0x1c8   :  { %v1794_v0 = vpop.f32.mrf.mxu1 }
 0x1c9   :  { %v371_v2 = vmax.f32 %v1794_v0, 0.0 }
 0x1ca   :  { %v1798_v3 = vpop.f32.mrf.mxu1 }
 0x1cb   :  { %v379_v6 = vpack.c.bf16 %v371_v2, %v370_v1  ;;  %v369_v7 = vmax.f32 %v1798_v3, 0.0 }
 0x1cd   :  { %v378_v9 = vpack.c.bf16 %v369_v7, %v368_v4  ;;  %1420 = vmatprep.subr.bf16.mxu1 %v379_v6 }
 0x1ce   :  { %1421 = vmatpush3.bf16.msra.mxu1 %v379_v6 }
 0x1cf   :  { %1422 = vmatprep.subr.bf16.mxu1 %v378_v9 }
 0x1d2   :  { %1423 = vmatpush3.bf16.msra.mxu1 %v378_v9 }
 0x1d3   :  { %1424 = vmatprep.subr.bf16.mxu1 %v377_v13 }
 0x1d6   :  { %1425 = vmatpush3.bf16.msra.mxu1 %v377_v13 }
 0x1d7   :  { %1426 = vmatprep.subr.bf16.mxu1 %v376_v22 }
 0x1da   :  { %1427 = vmatpush3.bf16.msra.mxu1 %v376_v22 }
 0x1db   :  { %1428 = vmatprep.subr.bf16.mxu1 %v375_v24 }
 0x1de   :  { %1429 = vmatpush3.bf16.msra.mxu1 %v375_v24 }
 0x1df   :  { %1430 = vmatprep.subr.bf16.mxu1 %v374_v28 }
 0x1e2   :  { %1431 = vmatpush3.bf16.msra.mxu1 %v374_v28 }
 0x1e3   :  { %1432 = vmatprep.subr.bf16.mxu1 %v373_v30 }
 0x1e6   :  { %1433 = vmatpush3.bf16.msra.mxu1 %v373_v30 }
 0x1e7   :  { %1434 = vmatprep.subr.bf16.mxu1 %v372_v33 }
 0x1ea   :  { %1435 = vmatpush3.bf16.msra.mxu1 %v372_v33 }
 0x1ed   :  { %1437 = vmatmul.mubr.bf16.vlgmr.msra.gmra.mxu1 %v1715_v11 }
 0x1ee   :  { %1440 = vmatprep.mubr.bf16.mxu1 %v1717_v12 }
 0x1f5   :  { %1441 = vmatmul.mubr.bf16.gmra.mxu1 %v1724_v14 }
 0x1f6   :  { %1444 = vmatprep.mubr.bf16.mxu1 %v1726_v15 }
 0x1fd   :  { %1445 = vmatmul.mubr.bf16.gmra.mxu1 %v1733_v17 }
 0x1fe   :  { %1448 = vmatprep.mubr.bf16.mxu1 %v1735_v18 }
 0x205   :  { %1449 = vmatmul.mubr.bf16.gmra.mxu1 %v1739_v19 }
 0x206   :  { %1492 = vmatprep.mubr.bf16.mxu1 %v1697_v5 }
 0x2ad   :  { %v1438_v35 = vpop.f32.mrf.mxu1 }
 0x2af   :  { %v414_v36 = vpop.f32.mrf.mxu1 }
 0x2b1   :  { %v1439_v37 = vpop.f32.mrf.mxu1 }
 0x2b2   :  { %v478_v40 = vpack.c.bf16 %v1439_v37, %v1438_v35  ;;  %v1594_v35 = vld [vmem:[%s2057_s4 + $0x10] sm:$0xff]  }
 0x2b3   :  { %v417_v38 = vpop.f32.mrf.mxu1 }
 0x2b4   :  { %v477_v39 = vpack.c.bf16 %v417_v38, %v414_v36  ;;  %v1595_v36 = vld [vmem:[%s2057_s4 + $0x8] sm:$0xff]  }
 0x2b5   :  { %v1442_v41 = vpop.f32.mrf.mxu1 }
 0x2b6   :  { %1460 = vmatprep.mubr.msk.bf16.mxu0 %vm517_vm2, %v477_v39 }
 0x2b7   :  { %v430_v42 = vpop.f32.mrf.mxu1  ;;  %1461 = vmatmul.mubr.msk.bf16.vlgmr.msra.gmra.mxu0 %vm517_vm2, %v478_v40 }
 0x2b8   :  { %1509 = vmatpush3.bf16.msra.mxu0 %v1593_v34 }
 0x2b9   :  { %v1443_v5 = vpop.f32.mrf.mxu1  ;;  %1510 = vmatprep.subr.bf16.mxu0 %v1594_v35 }
 0x2ba   :  { %v480_v45 = vpack.c.bf16 %v1443_v5, %v1442_v41 }
 0x2bb   :  { %v433_v43 = vpop.f32.mrf.mxu1 }
 0x2bc   :  { %v479_v44 = vpack.c.bf16 %v433_v43, %v430_v42  ;;  %1511 = vmatpush3.bf16.msra.mxu0 %v1594_v35 }
 0x2bd   :  { %v1446_v46 = vpop.f32.mrf.mxu1  ;;  %1512 = vmatprep.subr.bf16.mxu0 %v1595_v36 }
 0x2be   :  { %1464 = vmatprep.mubr.msk.bf16.mxu0 %vm517_vm2, %v479_v44 }
 0x2bf   :  { %v446_v47 = vpop.f32.mrf.mxu1  ;;  %1465 = vmatmul.mubr.msk.bf16.gmra.mxu0 %vm517_vm2, %v480_v45 }
 0x2c0   :  { %1513 = vmatpush3.bf16.msra.mxu0 %v1595_v36 }
 0x2c1   :  { %v1447_v48 = vpop.f32.mrf.mxu1  ;;  %1514 = vmatprep.subr.bf16.mxu0 %v1596_v51 }
 0x2c2   :  { %v482_v9 = vpack.c.bf16 %v1447_v48, %v1446_v46 }
 0x2c3   :  { %v449_v49 = vpop.f32.mrf.mxu1 }
 0x2c4   :  { %v481_v6 = vpack.c.bf16 %v449_v49, %v446_v47  ;;  %1515 = vmatpush3.bf16.msra.mxu0 %v1596_v51 }
 0x2c5   :  { %v1450_v13 = vpop.f32.mrf.mxu1 }
 0x2c6   :  { %1468 = vmatprep.mubr.msk.bf16.mxu0 %vm517_vm2, %v481_v6 }
 0x2c7   :  { %v462_v22 = vpop.f32.mrf.mxu1  ;;  %1469 = vmatmul.mubr.msk.bf16.gmra.mxu0 %vm517_vm2, %v482_v9 }
 0x2c9   :  { %v1451_v24 = vpop.f32.mrf.mxu1 }
 0x2ca   :  { %v484_v33 = vpack.c.bf16 %v1451_v24, %v1450_v13 }
 0x2cb   :  { %v465_v28 = vpop.f32.mrf.mxu1 }
 0x2cc   :  { %v483_v30 = vpack.c.bf16 %v465_v28, %v462_v22 }
 0x2ce   :  { %1472 = vmatprep.mubr.msk.bf16.mxu0 %vm517_vm2, %v483_v30 }
 0x2cf   :  { %1473 = vmatmul.mubr.msk.bf16.gmra.mxu0 %vm517_vm2, %v484_v33 }
 0x377   :  { %v1462_v37 = vpop.f32.mrf.mxu0 }
 0x379   :  { %v1874_v38 = vpop.f32.mrf.mxu0 }
 0x37b   :  { %v1463_v39 = vpop.f32.mrf.mxu0 }
 0x37d   :  { %v579_v40 = vpop.f32.mrf.mxu0 }
 0x37f   :  { %v1466_v41 = vpop.f32.mrf.mxu0 }
 0x381   :  { %v592_v42 = vpop.f32.mrf.mxu0 }
 0x383   :  { %v1467_v5 = vpop.f32.mrf.mxu0 }
 0x384   :  { %v646_v3 = vmax.f32 %v1467_v5, 0.0  ;;  %v643_v5 = vmax.f32 %v592_v42, 0.0 }
 0x385   :  { %v595_v43 = vpop.f32.mrf.mxu0 }
 0x386   :  { %v1916_v58 = vadd.f32 %v646_v3, %v363_v21  ;;  %v1932_v21 = vadd.f32 %v643_v5, %v360_v26 }
 0x387   :  { %v1470_v44 = vpop.f32.mrf.mxu0 }
 0x388   :  { %v649_v35 = vmax.f32 %v1470_v44, 0.0 }
 0x389   :  { %v608_v45 = vpop.f32.mrf.mxu0 }
 0x38a   :  { %v1902_v63 = vadd.f32 %v649_v35, %v366_v10  ;;  %v644_v10 = vmax.f32 %v595_v43, 0.0 }
 0x38b   :  { %v1471_v46 = vpop.f32.mrf.mxu0 }
 0x38c   :  { %v650_v28 = vmax.f32 %v1471_v46, 0.0  ;;  %v1926_v59 = vadd.f32 %v644_v10, %v361_v25 }
 0x38d   :  { %v611_v47 = vpop.f32.mrf.mxu0 }
 0x38e   :  { %v1896_v62 = vadd.f32 %v650_v28, %v367_v8  ;;  %v648_v0 = vmax.f32 %v611_v47, 0.0  ;;  %v673_v57 = vpack.c.bf16 %v1926_v59, %v1932_v21 }
 0x38f   :  { %v1474_v48 = vpop.f32.mrf.mxu0 }
 0x390   :  { %v653_v6 = vmax.f32 %v1474_v48, 0.0  ;;  %v676_v60 = vpack.c.bf16 %v1896_v62, %v1902_v63 }
 0x391   :  { %v624_v49 = vpop.f32.mrf.mxu0 }
 0x392   :  { %v651_v13 = vmax.f32 %v624_v49, 0.0  ;;  %v1878_v30 = vadd.f32 %v653_v6, %v370_v1 }
 0x393   :  { %v1475_v9 = vpop.f32.mrf.mxu0 }
 0x394   :  { %v654_v22 = vmax.f32 %v1475_v9, 0.0  ;;  %v1886_v36 = vadd.f32 %v651_v13, %v368_v4  ;;  %v1906_v4 = vadd.f32 %v648_v0, %v365_v16 }
 0x395   :  { %v627_v24 = vpop.f32.mrf.mxu0 }
 0x396   :  { %v1882_v33 = vadd.f32 %v654_v22, %v371_v2  ;;  %v652_v34 = vmax.f32 %v627_v24, 0.0  ;;  %v647_v2 = vmax.f32 %v608_v45, 0.0  ;;  %v1629_v22 = vmov 0.0  }
 0x397   :  { %1564 = vmatprep.subr.mxu0 %v1629_v22 }
 0x398   :  { %v1890_v48 = vadd.f32 %v652_v34, %v369_v7  ;;  %v678_v46 = vpack.c.bf16 %v1882_v33, %v1878_v30  ;;  %v645_v7 = vmax.f32 %v1466_v41, 0.0  ;;  %v1912_v8 = vadd.f32 %v647_v2, %v364_v20 }
 0x399   :  { %v642_v41 = vmax.f32 %v1463_v39, 0.0  ;;  %v641_v20 = vmax.f32 %v1462_v37, 0.0  ;;  %v639_v37 = vmax.f32 %v1874_v38, 0.0 }
 0x39a   :  { %1476 = vmatprep.subr.bf16.mxu1 %v678_v46  ;;  %v677_v1 = vpack.c.bf16 %v1890_v48, %v1886_v36  ;;  %v675_v61 = vpack.c.bf16 %v1906_v4, %v1912_v8  ;;  %v1922_v16 = vadd.f32 %v645_v7, %v362_v23  ;;  %v640_v23 = vmax.f32 %v579_v40, 0.0 }
 0x39b   :  { %1477 = vmatpush3.bf16.msra.mxu1 %v678_v46  ;;  %v1936_v54 = vadd.f32 %v642_v41, %v359_v27  ;;  %v1942_v25 = vadd.f32 %v641_v20, %v358_v29  ;;  %v1953_v26 = vadd.f32 %v639_v37, %v356_v32 }
 0x39c   :  { %1478 = vmatprep.subr.bf16.mxu1 %v677_v1  ;;  %v674_v56 = vpack.c.bf16 %v1916_v58, %v1922_v16  ;;  %v1947_v55 = vadd.f32 %v640_v23, %v357_v31 }
 0x39d   :  { %v672_v52 = vpack.c.bf16 %v1936_v54, %v1942_v25 }
 0x39e   :  { %v671_v50 = vpack.c.bf16 %v1947_v55, %v1953_v26 }
 0x39f   :  { %1479 = vmatpush3.bf16.msra.mxu1 %v677_v1 }
 0x3a0   :  { %1480 = vmatprep.subr.bf16.mxu1 %v676_v60 }
 0x3a3   :  { %1481 = vmatpush3.bf16.msra.mxu1 %v676_v60 }
 0x3a4   :  { %1482 = vmatprep.subr.bf16.mxu1 %v675_v61 }
 0x3a7   :  { %1483 = vmatpush3.bf16.msra.mxu1 %v675_v61 }
 0x3a8   :  { %1484 = vmatprep.subr.bf16.mxu1 %v674_v56 }
 0x3ab   :  { %1485 = vmatpush3.bf16.msra.mxu1 %v674_v56 }
 0x3ac   :  { %1486 = vmatprep.subr.bf16.mxu1 %v673_v57 }
 0x3af   :  { %1487 = vmatpush3.bf16.msra.mxu1 %v673_v57 }
 0x3b0   :  { %1488 = vmatprep.subr.bf16.mxu1 %v672_v52 }
 0x3b3   :  { %1489 = vmatpush3.bf16.msra.mxu1 %v672_v52 }
 0x3b4   :  { %1490 = vmatprep.subr.bf16.mxu1 %v671_v50 }
 0x3b7   :  { %1491 = vmatpush3.bf16.msra.mxu1 %v671_v50 }
 0x3b8   :  { %1532 = vmatprep.subr.bf16.mxu1 %v1629_v22 }
 0x3ba   :  { %1493 = vmatmul.mubr.bf16.vlgmr.msra.gmra.mxu1 %v1715_v11 }
 0x3bb   :  { %1496 = vmatprep.mubr.bf16.mxu1 %v1717_v12 }
 0x3c2   :  { %1497 = vmatmul.mubr.bf16.gmra.mxu1 %v1724_v14 }
 0x3c3   :  { %1500 = vmatprep.mubr.bf16.mxu1 %v1726_v15 }
 0x3ca   :  { %1501 = vmatmul.mubr.bf16.gmra.mxu1 %v1733_v17 }
 0x3cb   :  { %1504 = vmatprep.mubr.bf16.mxu1 %v1735_v18 }
 0x3d2   :  { %1505 = vmatmul.mubr.bf16.gmra.mxu1 %v1739_v19 }
 0x3d3   :  { %1548 = vmatprep.mubr.msk.bf16.mxu1 %vm1630_vm3, %v1629_v22 }
 0x47a   :  { %v1494_v53 = vpop.f32.mrf.mxu1 }
 0x47c   :  { %v713_v11 = vpop.f32.mrf.mxu1 }
 0x47e   :  { %v1495_v27 = vpop.f32.mrf.mxu1 }
 0x47f   :  { %v777_v14 = vpack.c.bf16 %v1495_v27, %v1494_v53 }
 0x480   :  { %v716_v12 = vpop.f32.mrf.mxu1 }
 0x481   :  { %v776_v29 = vpack.c.bf16 %v716_v12, %v713_v11 }
 0x482   :  { %v1498_v31 = vpop.f32.mrf.mxu1 }
 0x483   :  { %1516 = vmatprep.mubr.msk.bf16.mxu0 %vm517_vm2, %v776_v29 }
 0x484   :  { %v729_v15 = vpop.f32.mrf.mxu1  ;;  %1517 = vmatmul.mubr.msk.bf16.vlgmr.msra.gmra.mxu0 %vm517_vm2, %v777_v14 }
 0x486   :  { %v1499_v17 = vpop.f32.mrf.mxu1 }
 0x487   :  { %v779_v32 = vpack.c.bf16 %v1499_v17, %v1498_v31 }
 0x488   :  { %v732_v18 = vpop.f32.mrf.mxu1 }
 0x489   :  { %v778_v19 = vpack.c.bf16 %v732_v18, %v729_v15 }
 0x48a   :  { %v1502_v38 = vpop.f32.mrf.mxu1 }
 0x48b   :  { %1520 = vmatprep.mubr.msk.bf16.mxu0 %vm517_vm2, %v778_v19 }
 0x48c   :  { %v745_v39 = vpop.f32.mrf.mxu1  ;;  %1521 = vmatmul.mubr.msk.bf16.gmra.mxu0 %vm517_vm2, %v779_v32 }
 0x48e   :  { %v1503_v40 = vpop.f32.mrf.mxu1 }
 0x48f   :  { %v781_v44 = vpack.c.bf16 %v1503_v40, %v1502_v38 }
 0x490   :  { %v748_v42 = vpop.f32.mrf.mxu1 }
 0x491   :  { %v780_v43 = vpack.c.bf16 %v748_v42, %v745_v39 }
 0x492   :  { %v1506_v45 = vpop.f32.mrf.mxu1 }
 0x493   :  { %1524 = vmatprep.mubr.msk.bf16.mxu0 %vm517_vm2, %v780_v43 }
 0x494   :  { %v761_v47 = vpop.f32.mrf.mxu1  ;;  %1525 = vmatmul.mubr.msk.bf16.gmra.mxu0 %vm517_vm2, %v781_v44 }
 0x496   :  { %v1507_v49 = vpop.f32.mrf.mxu1 }
 0x497   :  { %v783_v13 = vpack.c.bf16 %v1507_v49, %v1506_v45 }
 0x498   :  { %v764_v6 = vpop.f32.mrf.mxu1 }
 0x499   :  { %v782_v9 = vpack.c.bf16 %v764_v6, %v761_v47  ;;  %v1600_v6 = vld [vmem:[%s2059_s6] sm:$0xff]  }
 0x49b   :  { %1528 = vmatprep.mubr.msk.bf16.mxu0 %vm517_vm2, %v782_v9  ;;  %v1098_v9 = vld [vmem:[%s2060_s7 + $0x18] sm:$0xff] }
 0x49c   :  { %1529 = vmatmul.mubr.msk.bf16.gmra.mxu0 %vm517_vm2, %v783_v13  ;;  %v1097_v13 = vld [vmem:[%s2060_s7 + $0x10] sm:$0xff] }
 0x49d   :  { %1572 = vmatprep.mubr.msk.f32.mxu0 %vm1630_vm3, %v1629_v22  ;;  %1565 = vmatpush3.msra.mxu0 %v1098_v9 }
 0x49e   :  { %1566 = vmatprep.subr.mxu0 %v1629_v22 }
 0x49f   :  { %1567 = vmatpush3.msra.mxu0 %v1097_v13 }
 0x4a0   :  { %1568 = vmatprep.subr.mxu0 %v1629_v22 }
 0x544   :  { %v1518_v24 = vpop.f32.mrf.mxu0 }
 0x545   :  { %v939_v42 = vmax.f32 %v1518_v24, 0.0  ;;  %v1096_v24 = vld [vmem:[%s2060_s7 + $0x8] sm:$0xff] }
 0x546   :  { %v1981_v28 = vpop.f32.mrf.mxu0  ;;  %1569 = vmatpush3.msra.mxu0 %v1096_v24 }
 0x547   :  { %v937_v45 = vmax.f32 %v1981_v28, 0.0  ;;  %v1095_v28 = vld [vmem:[%s2060_s7] sm:$0xff]  ;;  %1570 = vmatprep.subr.mxu0 %v1629_v22 }
 0x548   :  { %v1519_v34 = vpop.f32.mrf.mxu0  ;;  %1571 = vmatpush3.msra.mxu0 %v1095_v28 }
 0x549   :  { %v940_v39 = vmax.f32 %v1519_v34, 0.0 }
 0x54a   :  { %v1983_v35 = vpop.f32.mrf.mxu0 }
 0x54b   :  { %v938_v43 = vmax.f32 %v1983_v35, 0.0 }
 0x54c   :  { %v1522_v46 = vpop.f32.mrf.mxu0 }
 0x54d   :  { %v943_v18 = vmax.f32 %v1522_v46, 0.0 }
 0x54e   :  { %v890_v0 = vpop.f32.mrf.mxu0 }
 0x54f   :  { %v941_v38 = vmax.f32 %v890_v0, 0.0 }
 0x550   :  { %v1523_v1 = vpop.f32.mrf.mxu0 }
 0x552   :  { %v893_v2 = vpop.f32.mrf.mxu0 }
 0x553   :  { %v942_v19 = vmax.f32 %v893_v2, 0.0 }
 0x554   :  { %v1526_v3 = vpop.f32.mrf.mxu0 }
 0x555   :  { %v947_v27 = vmax.f32 %v1526_v3, 0.0 }
 0x556   :  { %v906_v60 = vpop.f32.mrf.mxu0 }
 0x557   :  { %v945_v15 = vmax.f32 %v906_v60, 0.0 }
 0x558   :  { %v1527_v7 = vpop.f32.mrf.mxu0 }
 0x559   :  { %v948_v51 = vmax.f32 %v1527_v7, 0.0 }
 0x55a   :  { %v909_v10 = vpop.f32.mrf.mxu0 }
 0x55b   :  { %v964_v29 = vadd.f32 %v948_v51, %v1896_v62  ;;  %v946_v14 = vmax.f32 %v909_v10, 0.0 }
 0x55c   :  { %v1530_v61 = vpop.f32.mrf.mxu0 }
 0x55d   :  { %v951_v41 = vmax.f32 %v1530_v61, 0.0  ;;  %v1265_v61 = vld [vmem:[%s2061_s8] ss:$0 sm:$0xff]  ;;  %s1631_s8 = smov [#allocation2]  }
 0x55e   :  { %v922_v5 = vpop.f32.mrf.mxu0  ;;  %s1210_s20 = sshll.u32 %s1631_s8, 4  ;;  %s1211_s20 = int_to_ptr.vmem [resolvable:$true] %s1210_s20 }
 0x55f   :  { %v967_v57 = vadd.f32 %v951_v41, %v1878_v30  ;;  %v949_v37 = vmax.f32 %v922_v5, 0.0  ;;  %v963_v30 = vadd.f32 %v947_v27, %v1902_v63  ;;  %v959_v63 = vadd.f32 %v943_v18, %v1922_v16  ;;  %s1607_s3 = scalar_lea.vmem %s1211_s20, 32  ;;  %p1612_p1 = scmp.lt.s32.totalorder %s1211_s20, %s1211_s20 }
 0x560   :  { %v1531_v56 = vpop.f32.mrf.mxu0  ;;  %v955_v16 = vadd.f32 %v939_v42, %v1942_v25  ;;  %v1597_v25 = vld [vmem:[%s2059_s6 + $0x18] sm:$0xff]   ;;  %p1608_p0 = scmp.ne.s32.totalorder %s1211_s20, %s1607_s3  ;;  %p1613_p2 = scmp.lt.s32.totalorder %s1607_s3, %s1607_s3 }
 0x561   :  { %v952_v20 = vmax.f32 %v1531_v56, 0.0  ;;  %v965_v12 = vadd.f32 %v949_v37, %v1886_v36  ;;  %v975_v17 = vpack.c.bf16 %v964_v29, %v963_v30  ;;  %v961_v36 = vadd.f32 %v945_v15, %v1912_v8 }
 0x562   :  { %v925_v23 = vpop.f32.mrf.mxu0  ;;  %v957_v8 = vadd.f32 %v941_v38, %v1932_v21  ;;  %v953_v21 = vadd.f32 %v937_v45, %v1953_v26  ;;  %v1599_v26 = vld [vmem:[%s2059_s6 + $0x8] sm:$0xff]   ;;  %v1198_v30 = vlaneseq  ;;  %p1614_p3 = por %p1613_p2, %p1612_p1 }
 0x563   :  { %v968_v52 = vadd.f32 %v952_v20, %v1882_v33  ;;  %v950_v50 = vmax.f32 %v925_v23, 0.0  ;;  %v944_v33 = vmax.f32 %v1523_v1, 0.0 }
 0x564   :  { %v1199_v15 = vand.u32 127, %v1198_v30  ;;  %p1615_p4 = pnand %p1614_p3, %p1608_p0 }
 0x565   :  { %v977_v53 = vpack.c.bf16 %v968_v52, %v967_v57  ;;  %v966_v11 = vadd.f32 %v950_v50, %v1890_v48  ;;  %v962_v48 = vadd.f32 %v946_v14, %v1906_v4  ;;  %v960_v62 = vadd.f32 %v944_v33, %v1916_v58 }
 0x566   :  { %v958_v4 = vadd.f32 %v942_v19, %v1926_v59  ;;  %v956_v58 = vadd.f32 %v940_v39, %v1936_v54  ;;  %v954_v59 = vadd.f32 %v938_v43, %v1947_v55  ;;  %v969_v54 = vld [vmem:[%s2058_s5] sm:$0x1]  ;;  %v1598_v55 = vld [vmem:[%s2059_s6 + $0x10] sm:$0xff]   ;;  %vm1200_vm6 = vcmp.eq.s32.totalorder %v1199_v15, 0 }
 0x567   :  { %1533 = vmatpush3.bf16.msra.mxu1 %v977_v53  ;;  %v976_v31 = vpack.c.bf16 %v966_v11, %v965_v12  ;;  %v974_v32 = vpack.c.bf16 %v962_v48, %v961_v36  ;;  %v973_v40 = vpack.c.bf16 %v960_v62, %v959_v63 }
 0x568   :  { %1534 = vmatprep.subr.bf16.mxu1 %v1629_v22  ;;  %v972_v44 = vpack.c.bf16 %v958_v4, %v957_v8  ;;  %v971_v47 = vpack.c.bf16 %v956_v58, %v955_v16  ;;  %v970_v49 = vpack.c.bf16 %v954_v59, %v953_v21 }
 0x56b   :  { %1535 = vmatpush3.bf16.msra.mxu1 %v976_v31 }
 0x56c   :  { %1536 = vmatprep.subr.bf16.mxu1 %v1629_v22 }
 0x56f   :  { %1537 = vmatpush3.bf16.msra.mxu1 %v975_v17 }
 0x570   :  { %1538 = vmatprep.subr.bf16.mxu1 %v1629_v22 }
 0x573   :  { %1539 = vmatpush3.bf16.msra.mxu1 %v974_v32 }
 0x574   :  { %1540 = vmatprep.subr.bf16.mxu1 %v1629_v22 }
 0x577   :  { %1541 = vmatpush3.bf16.msra.mxu1 %v973_v40 }
 0x578   :  { %1542 = vmatprep.subr.bf16.mxu1 %v1629_v22 }
 0x57b   :  { %1543 = vmatpush3.bf16.msra.mxu1 %v972_v44 }
 0x57c   :  { %1544 = vmatprep.subr.bf16.mxu1 %v1629_v22 }
 0x57f   :  { %1545 = vmatpush3.bf16.msra.mxu1 %v971_v47 }
 0x580   :  { %1546 = vmatprep.subr.bf16.mxu1 %v1629_v22 }
 0x583   :  { %1547 = vmatpush3.bf16.msra.mxu1 %v970_v49 }
 0x584   :  { %1552 = vmatprep.subr.bf16.mxu1 %v1629_v22 }
 0x586   :  { %1549 = vmatmul.mubr.bf16.vlgmr.msra.gmra.mxu1 %v969_v54 }
 0x587   :  { %1553 = vmatpush3.bf16.msra.mxu1 %v1597_v25  ;;  %1560 = vmatprep.mubr.msk.bf16.mxu1 %vm1630_vm3, %v1629_v22 }
 0x588   :  { %1554 = vmatprep.subr.bf16.mxu1 %v1629_v22 }
 0x58b   :  { %1555 = vmatpush3.bf16.msra.mxu1 %v1598_v55 }
 0x58c   :  { %1556 = vmatprep.subr.bf16.mxu1 %v1629_v22 }
 0x58f   :  { %1557 = vmatpush3.bf16.msra.mxu1 %v1599_v26 }
 0x590   :  { %1558 = vmatprep.subr.bf16.mxu1 %v1629_v22 }
 0x593   :  { %1559 = vmatpush3.bf16.msra.mxu1 %v1600_v6 }
 0x646   :  { %v1012_v34 = vpop.f32.mrf.mxu1 }
 0x647   :  { %v1018_v35 = vpack.c.bf16 %v1012_v34, %v1012_v34 }
 0x648   :  { %v1550_v46 = vpop.f32.mrf.mxu1 }
 0x649   :  { %1561 = vmatmul.mubr.msk.bf16.vlgmr.msra.gmra.mxu1 %vm517_vm2, %v1018_v35 }
 0x64a   :  { %v1015_v0 = vpop.f32.mrf.mxu1 }
 0x64c   :  { %v1551_v1 = vpop.f32.mrf.mxu1 }
 0x709   :  { %v1088_v2 = vpop.f32.mrf.mxu1 }
 0x70a   :  { %v1094_v3 = vmax.f32 %v1088_v2, 0.0 }
 0x70b   :  { %v1562_v60 = vpop.f32.mrf.mxu1 }
 0x70c   :  { %1573 = vmatmul.mubr.msk.f32.vlgmr.msra.gmra.mxu0 %vm1106_vm4, %v1094_v3 }
 0x70d   :  { %v1091_v7 = vpop.f32.mrf.mxu1 }
 0x70f   :  { %v1563_v10 = vpop.f32.mrf.mxu1 }
 0x7cc   :  { %v1176_v22 = vpop.f32.mrf.mxu0 }
 0x7cd   :  { %v1177_v5 = vadd.f32 %v1265_v61, %v1176_v22 }
 0x7ce   :  { %v1574_v41 = vpop.f32.mrf.mxu0 }
 0x7cf   :  { %v1181_v56 = vand.u32 2147483647, %v1177_v5  ;;  %v1180_v12 = vmax.f32 %v1177_v5, 0.0 }
 0x7d1   :  { %v1182_v20 = vsub.f32 0.0, %v1181_v56 }
 0x7d3   :  { %v1183_v23 = vmul.f32 1.442695, %v1182_v20 }
 0x7d5   :  { %1601 = vpow2.f32 %v1183_v23 }
 0x7e2   :  { %v1602_v57 = vpop.eup %1601 }
 0x7e3   :  { %v1185_v37 = vadd.f32 1.0, %v1602_v57  ;;  %v1188_v52 = vmul.f32 -0.5, %v1602_v57  ;;  %v1191_v51 = vand.u32 2147483647, %v1602_v57 }
 0x7e5   :  { %1603 = vlog2.f32 %v1185_v37  ;;  %v1189_v50 = vadd.f32 1.0, %v1188_v52  ;;  %vm1192_vm5 = vcmp.lt.f32.partialorder %v1191_v51, 0.0004427343 }
 0x7e7   :  { %v1190_v27 = vmul.f32 %v1602_v57, %v1189_v50 }
 0x7f2   :  { %v1604_v53 = vpop.eup %1603 }
 0x7f3   :  { %v1187_v11 = vmul.f32 0.6931472, %v1604_v53 }
 0x7f5   :  { %v1193_v29 = vsel %vm1192_vm5, %v1190_v27, %v1187_v11 }
 0x7f6   :  { %v1194_v14 = vadd.f32 %v1193_v29, %v1180_v12 }
 0x7f8   :  { %v1195_v31 = vadd.f32 1e-12, %v1194_v14 }
 0x7fa   :  { %1605 = vlog2.f32 %v1195_v31 }
 0x807   :  { %v1606_v33 = vpop.eup %1605 }
 0x808   :  { %v1197_v17 = vmul.f32 0.6931472, %v1606_v33 }
 0x80a   :  { %v1201_v48 = vsel %vm1200_vm6, %v1177_v5, %v1197_v17 }
 0x80b   :  { %1203 = vst.msk [vmem:[#allocation2] sm:$0x3] %vm1202_vm7, %v1201_v48 }
 0x80c   :  { %1618 = shalt.err (!%p1615_p4)
}
 0x80d   :  { %1213 = dma.vmem_to_hbm [thread:$0]  %s1211_s20, 32, %s2062_s9, [#allocation3]  }
 0x80e   :  { %1627 = dma.done.wait [#allocation3], 32  }
 0x80f   :  { %1628 = vsyncadd [#allocation3], 4294967264 }
 0x810   :  { %1217 = vsyncpa [#allocation3], 1 }

</bundles_post_ra>
